<compile_context>
chip_gen: v7x
topology: tpu7x:2x2x1
jax: 0.10.0
libtpu: 0.0.40
codegen_flags: <defaults>
</compile_context>

<pallas_src>
import jax
import jax.numpy as jnp
from jax.experimental import pallas as pl

# ---- "const" module values (synthetic, small) ------------------------------
GCNR_N_FEATURES = 16
HIDDEN_SIZE = 32
LAYERS = 3
GCNR_LAYER_TYPE = "GCN"   # GAT branch not exercised
N_NODES = 64

# Row offsets into the single packed parameter buffer.  HIDDEN_SIZE % 8 == 0,
# so every in-kernel slice starts on a sublane boundary (no misaligned reads).
_H = HIDDEN_SIZE
_R_W1 = 0
_R_W2 = 1 * _H
_R_B1 = 2 * _H
_R_B2 = 3 * _H
_R_WC = 4 * _H
_R_BC = 5 * _H
_P_ROWS = ((5 * _H + 1 + 7) // 8) * 8   # 168 rows, lane width = N_NODES


# ---- Fused Pallas kernel (transposed layout: nodes on the lane axis) --------
def gcnr_fused_kernel(at_ref, xt_ref, p_ref, o_ref):
    # at_ref: (N, N)       A_norm^T  (symmetric here, but pass ^T for generality)
    # xt_ref: (F, N)       node features, transposed
    # p_ref : (_P_ROWS, N) packed parameters (see pack_params)
    # o_ref : (1, N)       lane-dense output row (out^T)
    a = at_ref[...]

    w1t = p_ref[_R_W1:_R_W1 + _H, 0:GCNR_N_FEATURES]   # (H, F)
    w2t = p_ref[_R_W2:_R_W2 + _H, 0:_H]                 # (H, H)
    b1 = p_ref[_R_B1:_R_B1 + _H, :]                     # (H, N) pre-broadcast
    b2 = p_ref[_R_B2:_R_B2 + _H, :]                     # (H, N) pre-broadcast
    wc = p_ref[_R_WC:_R_WC + _H, :]                     # (H, N) pre-broadcast
    bc = p_ref[_R_BC:_R_BC + 1, :]                      # (1, N) pre-broadcast

    # ---- first GCN layer: h^T = relu(W1^T (X^T A^T) + b1^T) -----------------
    # Aggregate first so the intermediate stays (F, N).
    xa = jnp.dot(xt_ref[...], a, preferred_element_type=jnp.float32)        # (F, N)
    ht = jnp.maximum(
        jnp.dot(w1t, xa, preferred_element_type=jnp.float32) + b1, 0.0)     # (H, N)

    # ---- shared GCN layers (LAYERS - 1), fully unrolled; ht stays in vregs --
    for _ in range(LAYERS - 1):
        ha = jnp.dot(ht, a, preferred_element_type=jnp.float32)             # (H, N)
        ht = jnp.maximum(
            jnp.dot(w2t, ha, preferred_element_type=jnp.float32) + b2, 0.0)

    # ---- classifier: out^T = sum_h wc[h] * h^T[h, :] + bc --------------------
    # VPU multiply + sublane reduce instead of a 1-lane-wide MXU matmul;
    # the store is a single contiguous lane-dense row.
    o_ref[...] = (jnp.sum(ht * wc, axis=0, keepdims=True) + bc).astype(o_ref.dtype)


# ---- Wrapper ----------------------------------------------------------------
def pack_params(params, n):
    """Pack all weights/biases into one (168, n) f32 buffer (plain JAX glue)."""
    p = jnp.zeros((_P_ROWS, n), jnp.float32)
    p = p.at[_R_W1:_R_W1 + _H, 0:GCNR_N_FEATURES].set(params["w1"].T)
    p = p.at[_R_W2:_R_W2 + _H, 0:_H].set(params["w2"].T)
    p = p.at[_R_B1:_R_B1 + _H, :].set(jnp.broadcast_to(params["b1"].T, (_H, n)))
    p = p.at[_R_B2:_R_B2 + _H, :].set(jnp.broadcast_to(params["b2"].T, (_H, n)))
    p = p.at[_R_WC:_R_WC + _H, :].set(jnp.broadcast_to(params["wc"], (_H, n)))
    p = p.at[_R_BC:_R_BC + 1, :].set(jnp.broadcast_to(params["bc"], (1, n)))
    return p


def _gcnr_forward(params, x, a_norm):
    n = x.shape[0]
    packed = pack_params(params, n)
    out_t = pl.pallas_call(
        gcnr_fused_kernel,
        out_shape=jax.ShapeDtypeStruct((1, n), jnp.float32),
        cost_estimate=pl.CostEstimate(
            flops=1_000_000, transcendentals=0, bytes_accessed=63_744),
    )(a_norm.T, x.T, packed)
    return out_t.reshape(n, 1)


gcnr_forward = jax.jit(_gcnr_forward)


# ---- Graph glue (plain JAX) -------------------------------------------------
def build_norm_adj(edge_index, n):
    """Dense GCN-normalized adjacency: D^{-1/2} (A + I) D^{-1/2}."""
    src, dst = edge_index
    a = jnp.zeros((n, n), jnp.float32).at[dst, src].set(1.0)
    diag = jnp.arange(n)
    a = a.at[diag, diag].set(1.0)  # add self-loops
    deg = a.sum(axis=1)
    dinv = jax.lax.rsqrt(deg)      # deg >= 1 thanks to self-loops
    return a * dinv[:, None] * dinv[None, :]


# ---- Main -------------------------------------------------------------------
if __name__ == "__main__":
    key = jax.random.PRNGKey(0)
    k_x, k_e1, k_e2, k_w1, k_b1, k_w2, k_b2, k_wc, k_bc = jax.random.split(key, 9)

    # Node features and a random symmetric edge set.
    x = jax.random.normal(k_x, (N_NODES, GCNR_N_FEATURES), jnp.float32)
    n_edges = 256
    src = jax.random.randint(k_e1, (n_edges,), 0, N_NODES)
    dst = jax.random.randint(k_e2, (n_edges,), 0, N_NODES)
    edge_index = jnp.stack(
        [jnp.concatenate([src, dst]), jnp.concatenate([dst, src])], axis=0
    )
    a_norm = build_norm_adj(edge_index, N_NODES)

    # Deterministic synthetic parameters (shapes from the module __init__).
    params = {
        "w1": 0.1 * jax.random.normal(k_w1, (GCNR_N_FEATURES, HIDDEN_SIZE), jnp.float32),
        "b1": 0.1 * jax.random.normal(k_b1, (1, HIDDEN_SIZE), jnp.float32),
        "w2": 0.1 * jax.random.normal(k_w2, (HIDDEN_SIZE, HIDDEN_SIZE), jnp.float32),
        "b2": 0.1 * jax.random.normal(k_b2, (1, HIDDEN_SIZE), jnp.float32),
        "wc": 0.1 * jax.random.normal(k_wc, (HIDDEN_SIZE, 1), jnp.float32),
        "bc": 0.1 * jax.random.normal(k_bc, (1, 1), jnp.float32),
    }

    out = jax.block_until_ready(gcnr_forward(params, x, a_norm))

    # Pure-JAX reference with identical math (PyG GCNConv order).
    def ref_forward(p, xx, a):
        h = jnp.maximum(a @ (xx @ p["w1"]) + p["b1"], 0.0)
        for _ in range(1, LAYERS):
            h = jnp.maximum(a @ (h @ p["w2"]) + p["b2"], 0.0)
        return h @ p["wc"] + p["bc"]

    ref = ref_forward(params, x, a_norm)
    assert out.shape == (N_NODES, 1), out.shape
    assert jnp.allclose(out, ref, atol=1e-4, rtol=1e-4), float(
        jnp.max(jnp.abs(out - ref))
    )
    print("KERNEL_OK")
</pallas_src>

<mosaic_0001>
module attributes {stable_mosaic.version = 11 : i64} {
  func.func @gcnr_fused_kernel(%arg0: memref<64x64xf32, #tpu.memory_space<vmem>>, %arg1: memref<16x64xf32, #tpu.memory_space<vmem>>, %arg2: memref<168x64xf32, #tpu.memory_space<vmem>>, %arg3: memref<1x64xf32, #tpu.memory_space<vmem>>) attributes {dimension_semantics = [], scalar_prefetch = 0 : i64, scratch_operands = 0 : i64, tpu.core_type = #tpu.core_type<tc>} {
    %c0 = arith.constant 0 : index
    %c0_0 = arith.constant 0 : index
    %0 = vector.load %arg0[%c0, %c0_0] : memref<64x64xf32, #tpu.memory_space<vmem>>, vector<64x64xf32>
    %c0_1 = arith.constant 0 : index
    %c0_2 = arith.constant 0 : index
    %1 = vector.load %arg2[%c0_1, %c0_2] : memref<168x64xf32, #tpu.memory_space<vmem>>, vector<32x16xf32>
    %c32 = arith.constant 32 : index
    %c0_3 = arith.constant 0 : index
    %2 = vector.load %arg2[%c32, %c0_3] : memref<168x64xf32, #tpu.memory_space<vmem>>, vector<32x32xf32>
    %c64 = arith.constant 64 : index
    %c0_4 = arith.constant 0 : index
    %3 = vector.load %arg2[%c64, %c0_4] : memref<168x64xf32, #tpu.memory_space<vmem>>, vector<32x64xf32>
    %c96 = arith.constant 96 : index
    %c0_5 = arith.constant 0 : index
    %4 = vector.load %arg2[%c96, %c0_5] : memref<168x64xf32, #tpu.memory_space<vmem>>, vector<32x64xf32>
    %c128 = arith.constant 128 : index
    %c0_6 = arith.constant 0 : index
    %5 = vector.load %arg2[%c128, %c0_6] : memref<168x64xf32, #tpu.memory_space<vmem>>, vector<32x64xf32>
    %c160 = arith.constant 160 : index
    %c0_7 = arith.constant 0 : index
    %6 = vector.load %arg2[%c160, %c0_7] : memref<168x64xf32, #tpu.memory_space<vmem>>, vector<1x64xf32>
    %c0_8 = arith.constant 0 : index
    %c0_9 = arith.constant 0 : index
    %7 = vector.load %arg1[%c0_8, %c0_9] : memref<16x64xf32, #tpu.memory_space<vmem>>, vector<16x64xf32>
    %cst = arith.constant dense<0.000000e+00> : vector<16x64xf32>
    %8 = tpu.matmul %7, %0, %cst {dimension_numbers = #tpu.dot_dimension_numbers<[1], [0], [0], [1], [0, 0, 1, 1], [], []>} : vector<16x64xf32>, vector<64x64xf32>, vector<16x64xf32> -> vector<16x64xf32>
    %cst_10 = arith.constant dense<0.000000e+00> : vector<32x64xf32>
    %9 = tpu.matmul %1, %8, %cst_10 {dimension_numbers = #tpu.dot_dimension_numbers<[1], [0], [0], [1], [0, 0, 1, 1], [], []>} : vector<32x16xf32>, vector<16x64xf32>, vector<32x64xf32> -> vector<32x64xf32>
    %10 = arith.addf %9, %3 : vector<32x64xf32>
    %cst_11 = arith.constant 0.000000e+00 : f32
    %11 = vector.broadcast %cst_11 : f32 to vector<32x64xf32>
    %12 = arith.maximumf %10, %11 : vector<32x64xf32>
    %cst_12 = arith.constant dense<0.000000e+00> : vector<32x64xf32>
    %13 = tpu.matmul %12, %0, %cst_12 {dimension_numbers = #tpu.dot_dimension_numbers<[1], [0], [0], [1], [0, 0, 1, 1], [], []>} : vector<32x64xf32>, vector<64x64xf32>, vector<32x64xf32> -> vector<32x64xf32>
    %cst_13 = arith.constant dense<0.000000e+00> : vector<32x64xf32>
    %14 = tpu.matmul %2, %13, %cst_13 {dimension_numbers = #tpu.dot_dimension_numbers<[1], [0], [0], [1], [0, 0, 1, 1], [], []>} : vector<32x32xf32>, vector<32x64xf32>, vector<32x64xf32> -> vector<32x64xf32>
    %15 = arith.addf %14, %4 : vector<32x64xf32>
    %cst_14 = arith.constant 0.000000e+00 : f32
    %16 = vector.broadcast %cst_14 : f32 to vector<32x64xf32>
    %17 = arith.maximumf %15, %16 : vector<32x64xf32>
    %cst_15 = arith.constant dense<0.000000e+00> : vector<32x64xf32>
    %18 = tpu.matmul %17, %0, %cst_15 {dimension_numbers = #tpu.dot_dimension_numbers<[1], [0], [0], [1], [0, 0, 1, 1], [], []>} : vector<32x64xf32>, vector<64x64xf32>, vector<32x64xf32> -> vector<32x64xf32>
    %cst_16 = arith.constant dense<0.000000e+00> : vector<32x64xf32>
    %19 = tpu.matmul %2, %18, %cst_16 {dimension_numbers = #tpu.dot_dimension_numbers<[1], [0], [0], [1], [0, 0, 1, 1], [], []>} : vector<32x32xf32>, vector<32x64xf32>, vector<32x64xf32> -> vector<32x64xf32>
    %20 = arith.addf %19, %4 : vector<32x64xf32>
    %cst_17 = arith.constant 0.000000e+00 : f32
    %21 = vector.broadcast %cst_17 : f32 to vector<32x64xf32>
    %22 = arith.maximumf %20, %21 : vector<32x64xf32>
    %23 = arith.mulf %22, %5 : vector<32x64xf32>
    %cst_18 = arith.constant dense<0.000000e+00> : vector<64xf32>
    %24 = vector.multi_reduction <add>, %23, %cst_18 [0] : vector<32x64xf32> to vector<64xf32>
    %25 = vector.shape_cast %24 : vector<64xf32> to vector<1x64xf32>
    %26 = arith.addf %25, %6 : vector<1x64xf32>
    %c0_19 = arith.constant 0 : index
    %c0_20 = arith.constant 0 : index
    %27 = vector.load %arg3[%c0_19, %c0_20] : memref<1x64xf32, #tpu.memory_space<vmem>>, vector<1x64xf32>
    tpu.vector_store %arg3[%c0_19, %c0_20], %26 {strides = array<i32>} : memref<1x64xf32, #tpu.memory_space<vmem>>, vector<1x64xf32>,
    return
  }
}

</mosaic_0001>

<bundles_post_ra>
// kernel: _gcnr_forward.1
= control target key start
LH: loop header
LB: loop body
LE: loop exit
PB: predicated region body
PF: predicated region fallthrough
CT: control target
= control target key end

     0   :  { %vm46_vm0 = vcmask 523264   ;;  %s1077_s0 = inlined_call_operand.vmem [shape: f32[64,64], index: 0, kind: input, shape index: {}]   ;;  %s1078_s1 = inlined_call_operand.vmem [shape: f32[16,64], index: 1, kind: input, shape index: {}]   ;;  %s1079_s2 = inlined_call_operand.vmem [shape: f32[168,64], index: 2, kind: input, shape index: {}]   ;;  %s1080_s3 = inlined_call_operand.hbm [shape: f32[1,64], index: 3, kind: output, shape index: {}]  }
   0x1   :  { %v15_v0 = vld [vmem:[%s1077_s0] sm:$0xff]  ;;  %v16_v1 = vld [vmem:[%s1077_s0 + $0x8] sm:$0xff]  ;;  %v17_v2 = vld [vmem:[%s1077_s0 + $0x10] sm:$0xff] }
   0x2   :  { %v828_v3 = vpack.c.bf16 %v16_v1, %v15_v0  ;;  %v18_v4 = vld [vmem:[%s1077_s0 + $0x18] sm:$0xff]  ;;  %v19_v6 = vld [vmem:[%s1077_s0 + $0x20] sm:$0xff]  ;;  %v20_v7 = vld [vmem:[%s1077_s0 + $0x28] sm:$0xff] }
   0x3   :  { %v954_v5 = vpack.c.bf16 %v18_v4, %v17_v2  ;;  %v44_v8 = vld [vmem:[%s1078_s1] sm:$0xff] }
   0x4   :  { %829 = vmatprep.subr.bf16.mxu0 %v828_v3  ;;  %743 = vmatprep.mubr.msk.f32.mxu0 %vm46_vm0, %v44_v8 }
   0x5   :  { %8 = vsyncpa [#allocation3], 0  ;;  %831 = vmatpush3.bf16.msra.mxu0 %v828_v3  ;;  %v836_v9 = vpack.c.bf16 %v20_v7, %v19_v6  ;;  %v21_v10 = vld [vmem:[%s1077_s0 + $0x30] sm:$0xff]  ;;  %v22_v11 = vld [vmem:[%s1077_s0 + $0x38] sm:$0xff]  ;;  %vm128_vm1 = vcmask 130048   ;;  %vm327_vm2 = vcmask 261120  }
   0x6   :  { %833 = vmatprep.subr.bf16.mxu0 %v954_v5  ;;  %v840_v12 = vpack.c.bf16 %v22_v11, %v21_v10  ;;  %v45_v13 = vld [vmem:[%s1078_s1 + $0x8] sm:$0xff]  ;;  %v23_v14 = vld [vmem:[%s1079_s2] sm:$0xff]  ;;  %v25_v19 = vld [vmem:[%s1079_s2 + $0x10] sm:$0xff]  ;;  %s921_s16 = smov [#allocation2]   ;;  %vm633_vm3 = vcmask 516096  }
   0x7   :  { %750 = vmatprep.mubr.msk.f32.mxu1 %vm128_vm1, %v23_v14  ;;  %v24_v18 = vld [vmem:[%s1079_s2 + $0x8] sm:$0xff]  ;;  %v26_v20 = vld [vmem:[%s1079_s2 + $0x18] sm:$0xff]  ;;  %v31_v22 = vld [vmem:[%s1079_s2 + $0x40] sm:$0xff]  ;;  %s641_s17 = sshll.u32 %s921_s16, 4  ;;  %s642_s17 = int_to_ptr.vmem [resolvable:$true] %s641_s17 }
   0x8   :  { %v32_v21 = vld [vmem:[%s1079_s2 + $0x48] sm:$0xff]  ;;  %v34_v27 = vld [vmem:[%s1079_s2 + $0x58] sm:$0xff]  ;;  %v33_v28 = vld [vmem:[%s1079_s2 + $0x50] sm:$0xff]  ;;  %s897_s18 = scalar_lea.vmem %s642_s17, 16  ;;  %s901_s19 = scalar_lea.vmem %s642_s17, 32 }
   0x9   :  { %835 = vmatpush3.bf16.msra.mxu0 %v954_v5  ;;  %v27_v37 = vld [vmem:[%s1079_s2 + $0x20] sm:$0xff]  ;;  %v28_v44 = vld [vmem:[%s1079_s2 + $0x28] sm:$0xff]  ;;  %v29_v45 = vld [vmem:[%s1079_s2 + $0x30] sm:$0xff]  ;;  %p898_p0 = scmp.ne.s32.totalorder %s642_s17, %s897_s18  ;;  %p902_p1 = scmp.lt.s32.totalorder %s642_s17, %s642_s17 }
   0xa   :  { %837 = vmatprep.subr.bf16.mxu0 %v836_v9  ;;  %v30_v46 = vld [vmem:[%s1079_s2 + $0x38] sm:$0xff]  ;;  %v36_v47 = vld [vmem:[%s1079_s2 + $0x68] sm:$0xff]  ;;  %v35_v48 = vld [vmem:[%s1079_s2 + $0x60] sm:$0xff]  ;;  %p903_p2 = scmp.lt.s32.totalorder %s901_s19, %s897_s18 }
   0xb   :  { %v38_v53 = vld [vmem:[%s1079_s2 + $0x78] sm:$0xff]  ;;  %v37_v54 = vld [vmem:[%s1079_s2 + $0x70] sm:$0xff]  ;;  %v40_v8 = vld [vmem:[%s1079_s2 + $0x88] sm:$0xff] }
   0xc   :  { %v39_v11 = vld [vmem:[%s1079_s2 + $0x80] sm:$0xff]  ;;  %p904_p3 = por %p903_p2, %p902_p1 }
   0xd   :  { %839 = vmatpush3.bf16.msra.mxu0 %v836_v9 }
   0xe   :  { %841 = vmatprep.subr.bf16.mxu0 %v840_v12  ;;  %p905_p4 = pnand %p904_p3, %p898_p0 }
  0x11   :  { %843 = vmatpush3.bf16.msra.mxu0 %v840_v12 }
  0x14   :  { %744 = vmatmul.mubr.msk.f32.vlgmr.msra.gmra.mrb[0].mxu0 %vm46_vm0, %v45_v13 }
  0x15   :  { %786 = vmatprep.mubr.msk.f32.mxu0 %vm327_vm2, %v27_v37 }
  0xe7   :  { %v745_v15 = vpop.f32.mrb[0].mxu0 }
  0xe8   :  { %v119_v16 = vpop.f32.mrb[1].mxu0 }
  0xe9   :  { %v844_v17 = vpack.c.bf16 %v745_v15, %v119_v16 }
  0xeb   :  { %845 = vmatprep.subr.bf16.mxu1 %v844_v17 }
  0xec   :  { %847 = vmatpush3.bf16.msra.mxu1 %v844_v17 }
  0xed   :  { %849 = vmatprep.subr.bf16.mxu1 %v828_v3 }
  0xef   :  { %751 = vmatmul.mubr.msk.f32.vlgmr.msra.gmra.mrb[0].mxu1 %vm128_vm1, %v24_v18 }
  0xf0   :  { %753 = vmatprep.mubr.msk.f32.mxu1 %vm128_vm1, %v25_v19  ;;  %851 = vmatpush3.bf16.msra.mxu1 %v828_v3 }
  0xf1   :  { %853 = vmatprep.subr.bf16.mxu1 %v954_v5 }
  0xf3   :  { %754 = vmatmul.mubr.msk.f32.gmra.mrb[2].mxu1 %vm128_vm1, %v26_v20  ;;  %v42_v20 = vld [vmem:[%s1079_s2 + $0x98] sm:$0xff] }
  0xf4   :  { %855 = vmatpush3.bf16.msra.mxu1 %v954_v5 }
  0xf5   :  { %857 = vmatprep.subr.bf16.mxu1 %v836_v9 }
  0xf8   :  { %859 = vmatpush3.bf16.msra.mxu1 %v836_v9 }
  0xf9   :  { %861 = vmatprep.subr.bf16.mxu1 %v840_v12 }
  0xfc   :  { %863 = vmatpush3.bf16.msra.mxu1 %v840_v12 }
  0xfd   :  { %873 = vmatprep.subr.bf16.mxu1 %v828_v3 }
 0x1c2   :  { %v752_v23 = vpop.f32.mrb[0].mxu1 }
 0x1c3   :  { %v213_v24 = vadd.f32 %v752_v23, %v32_v21  ;;  %v207_v25 = vpop.f32.mrb[1].mxu1 }
 0x1c4   :  { %v208_v26 = vadd.f32 %v207_v25, %v31_v22  ;;  %v41_v22 = vld [vmem:[%s1079_s2 + $0x90] sm:$0xff] }
 0x1c5   :  { %v227_v31 = vmax.f32 %v213_v24, 0.0 }
 0x1c6   :  { %v226_v29 = vmax.f32 %v208_v26, 0.0  ;;  %v755_v30 = vpop.f32.mrb[2].mxu1 }
 0x1c7   :  { %v223_v32 = vadd.f32 %v755_v30, %v34_v27  ;;  %v217_v33 = vpop.f32.mrb[3].mxu1 }
 0x1c8   :  { %v218_v34 = vadd.f32 %v217_v33, %v33_v28  ;;  %772 = vmatprep.mubr.msk.f32.mxu1 %vm46_vm0, %v226_v29 }
 0x1c9   :  { %773 = vmatmul.mubr.msk.f32.vlgmr.msra.gmra.mrb[4].mxu1 %vm46_vm0, %v227_v31  ;;  %v229_v36 = vmax.f32 %v223_v32, 0.0 }
 0x1ca   :  { %v228_v35 = vmax.f32 %v218_v34, 0.0  ;;  %875 = vmatpush3.bf16.msra.mxu1 %v828_v3 }
 0x1cb   :  { %877 = vmatprep.subr.bf16.mxu1 %v954_v5 }
 0x1cc   :  { %775 = vmatprep.mubr.msk.f32.mxu1 %vm46_vm0, %v228_v35 }
 0x1cd   :  { %776 = vmatmul.mubr.msk.f32.gmra.mrb[6].mxu1 %vm46_vm0, %v229_v36 }
 0x1ce   :  { %879 = vmatpush3.bf16.msra.mxu1 %v954_v5 }
 0x1cf   :  { %881 = vmatprep.subr.bf16.mxu1 %v836_v9 }
 0x1d2   :  { %883 = vmatpush3.bf16.msra.mxu1 %v836_v9 }
 0x1d3   :  { %885 = vmatprep.subr.bf16.mxu1 %v840_v12 }
 0x1d6   :  { %887 = vmatpush3.bf16.msra.mxu1 %v840_v12 }
 0x29c   :  { %v774_v38 = vpop.f32.mrb[4].mxu1 }
 0x29d   :  { %v308_v39 = vpop.f32.mrb[5].mxu1 }
 0x29e   :  { %v864_v40 = vpack.c.bf16 %v774_v38, %v308_v39 }
 0x2a0   :  { %v777_v41 = vpop.f32.mrb[6].mxu1  ;;  %865 = vmatprep.subr.bf16.mxu0 %v864_v40 }
 0x2a1   :  { %v318_v42 = vpop.f32.mrb[7].mxu1  ;;  %867 = vmatpush3.bf16.msra.mxu0 %v864_v40 }
 0x2a2   :  { %v868_v43 = vpack.c.bf16 %v777_v41, %v318_v42 }
 0x2a4   :  { %869 = vmatprep.subr.bf16.mxu0 %v868_v43 }
 0x2a5   :  { %871 = vmatpush3.bf16.msra.mxu0 %v868_v43 }
 0x2a8   :  { %787 = vmatmul.mubr.msk.f32.vlgmr.msra.gmra.mrb[2].mxu0 %vm327_vm2, %v28_v44 }
 0x2a9   :  { %789 = vmatprep.mubr.msk.f32.mxu0 %vm327_vm2, %v29_v45 }
 0x2ac   :  { %790 = vmatmul.mubr.msk.f32.gmra.mrb[4].mxu0 %vm327_vm2, %v30_v46 }
 0x2ad   :  { %822 = vmatprep.mubr.msk.f32.mxu0 %vm327_vm2, %v27_v37  ;;  %v43_v37 = vld [vmem:[%s1079_s2 + $0xa0] sm:$0x1] }
 0x37b   :  { %v788_v49 = vpop.f32.mrb[2].mxu0 }
 0x37c   :  { %v412_v50 = vadd.f32 %v788_v49, %v36_v47  ;;  %v406_v51 = vpop.f32.mrb[3].mxu0 }
 0x37d   :  { %v407_v52 = vadd.f32 %v406_v51, %v35_v48 }
 0x37e   :  { %v426_v57 = vmax.f32 %v412_v50, 0.0 }
 0x37f   :  { %v425_v55 = vmax.f32 %v407_v52, 0.0  ;;  %v791_v56 = vpop.f32.mrb[4].mxu0 }
 0x380   :  { %v422_v58 = vadd.f32 %v791_v56, %v38_v53  ;;  %v416_v59 = vpop.f32.mrb[5].mxu0 }
 0x381   :  { %v417_v60 = vadd.f32 %v416_v59, %v37_v54  ;;  %808 = vmatprep.mubr.msk.f32.mxu1 %vm46_vm0, %v425_v55 }
 0x382   :  { %809 = vmatmul.mubr.msk.f32.vlgmr.msra.gmra.mrb[8].mxu1 %vm46_vm0, %v426_v57  ;;  %v428_v62 = vmax.f32 %v422_v58, 0.0 }
 0x383   :  { %v427_v61 = vmax.f32 %v417_v60, 0.0 }
 0x385   :  { %811 = vmatprep.mubr.msk.f32.mxu1 %vm46_vm0, %v427_v61 }
 0x386   :  { %812 = vmatmul.mubr.msk.f32.gmra.mrb[10].mxu1 %vm46_vm0, %v428_v62 }
 0x455   :  { %v810_v63 = vpop.f32.mrb[8].mxu1 }
 0x456   :  { %v507_v0 = vpop.f32.mrb[9].mxu1 }
 0x457   :  { %v888_v1 = vpack.c.bf16 %v810_v63, %v507_v0 }
 0x459   :  { %v813_v2 = vpop.f32.mrb[10].mxu1  ;;  %889 = vmatprep.subr.bf16.mxu0 %v888_v1 }
 0x45a   :  { %v517_v3 = vpop.f32.mrb[11].mxu1  ;;  %891 = vmatpush3.bf16.msra.mxu0 %v888_v1 }
 0x45b   :  { %v892_v4 = vpack.c.bf16 %v813_v2, %v517_v3 }
 0x45d   :  { %893 = vmatprep.subr.bf16.mxu0 %v892_v4 }
 0x45e   :  { %895 = vmatpush3.bf16.msra.mxu0 %v892_v4 }
 0x461   :  { %823 = vmatmul.mubr.msk.f32.vlgmr.msra.gmra.mrb[6].mxu0 %vm327_vm2, %v28_v44 }
 0x462   :  { %825 = vmatprep.mubr.msk.f32.mxu0 %vm327_vm2, %v29_v45 }
 0x465   :  { %826 = vmatmul.mubr.msk.f32.gmra.mrb[8].mxu0 %vm327_vm2, %v30_v46 }
 0x534   :  { %v824_v5 = vpop.f32.mrb[6].mxu0 }
 0x535   :  { %v598_v6 = vadd.f32 %v824_v5, %v36_v47  ;;  %v592_v7 = vpop.f32.mrb[7].mxu0 }
 0x536   :  { %v593_v9 = vadd.f32 %v592_v7, %v35_v48 }
 0x537   :  { %v612_v10 = vmax.f32 %v598_v6, 0.0 }
 0x538   :  { %v611_v12 = vmax.f32 %v593_v9, 0.0  ;;  %v827_v13 = vpop.f32.mrb[8].mxu0 }
 0x539   :  { %v616_v14 = vmul.f32 %v612_v10, %v40_v8  ;;  %v608_v15 = vadd.f32 %v827_v13, %v38_v53  ;;  %v602_v16 = vpop.f32.mrb[9].mxu0 }
 0x53a   :  { %v615_v17 = vmul.f32 %v611_v12, %v39_v11  ;;  %v603_v18 = vadd.f32 %v602_v16, %v37_v54 }
 0x53b   :  { %v620_v19 = vsel %vm46_vm0, %v616_v14, 0.0  ;;  %v614_v21 = vmax.f32 %v608_v15, 0.0 }
 0x53c   :  { %v619_v23 = vsel %vm46_vm0, %v615_v17, 0.0  ;;  %v613_v24 = vmax.f32 %v603_v18, 0.0 }
 0x53d   :  { %v621_v25 = vadd.f32 %v620_v19, %v619_v23  ;;  %v618_v26 = vmul.f32 %v614_v21, %v42_v20 }
 0x53e   :  { %v617_v27 = vmul.f32 %v613_v24, %v41_v22 }
 0x53f   :  { %v624_v30 = vsel %vm46_vm0, %v618_v26, 0.0 }
 0x540   :  { %v622_v28 = vsel %vm46_vm0, %v617_v27, 0.0 }
 0x541   :  { %v623_v29 = vadd.f32 %v622_v28, %v621_v25 }
 0x543   :  { %v625_v31 = vadd.f32 %v624_v30, %v623_v29 }
 0x545   :  { %v626_v32 = vrot.slane %v625_v31, 4 }
 0x547   :  { %v627_v33 = vadd.f32 %v626_v32, %v625_v31 }
 0x549   :  { %v628_v34 = vrot.slane %v627_v33, 2 }
 0x54b   :  { %v629_v35 = vadd.f32 %v628_v34, %v627_v33 }
 0x54d   :  { %v630_v36 = vrot.slane %v629_v35, 1 }
 0x54f   :  { %v631_v38 = vadd.f32 %v630_v36, %v629_v35 }
 0x551   :  { %v632_v39 = vadd.f32 %v631_v38, %v43_v37 }
 0x553   :  { %634 = vst.msk [vmem:[#allocation2] sm:$0x1] %vm633_vm3, %v632_v39 }
 0x554   :  { %908 = shalt.err (!%p905_p4)
}
 0x555   :  { %s909_s22 = scalar_lea.hbm %s1080_s3, 16 }
 0x556   :  { %p910_p5 = scmp.ne.s32.totalorder %s1080_s3, %s909_s22  ;;  %p913_p6 = scmp.lt.u32.totalorder %s909_s22, %s1080_s3 }
 0x558   :  { %p915_p7 = pnand %p913_p6, %p910_p5 }
 0x55a   :  { %918 = shalt.err (!%p915_p7)
}
 0x55b   :  { %644 = dma.vmem_to_hbm [thread:$0]  %s642_s17, 16, %s1080_s3, [#allocation3]  }
 0x55c   :  { %919 = dma.done.wait [#allocation3], 16  }
 0x55d   :  { %920 = vsyncadd [#allocation3], 4294967280 }
 0x55e   :  { %648 = vsyncpa [#allocation3], 1 }

</bundles_post_ra>
